<compile_context>
chip_gen: v7x
topology: tpu7x:2x2x1
jax: 0.10.0
libtpu: 0.0.40
codegen_flags: <defaults>
</compile_context>

<pallas_src>
import functools

import jax
import jax.numpy as jnp
from jax import lax
from jax.experimental import pallas as pl
from jax.experimental.pallas import tpu as pltpu


def _tpu_defaults():
    """Best-effort query of per-chip VMEM capacity and TensorCore count."""
    vmem_bytes = 64 * 1024 * 1024   # conservative (v7x-sized) fallback
    num_cores = 1                   # conservative fallback: single TensorCore
    try:
        info = pltpu.get_tpu_info()
        v = getattr(info, "vmem_capacity_bytes", None)
        if isinstance(v, int) and v > 0:
            vmem_bytes = v
        for name in ("num_cores_per_chip", "cores_per_chip",
                     "tensorcores_per_chip", "num_tensorcores"):
            c = getattr(info, name, None)
            if isinstance(c, int) and 1 <= c <= 8:
                num_cores = c
                break
    except Exception:
        pass
    return vmem_bytes, num_cores


_VMEM_CAPACITY_BYTES, _NUM_TENSORCORES = _tpu_defaults()

# Per-input-buffer block budget + scoped-VMEM limit, sized per generation:
#   >=96 MiB VMEM chips (v5e/v6e): 8 MiB/buffer -> 32 MiB double-buffered inputs
#    <96 MiB VMEM chips (v7x/unknown): 4 MiB/buffer -> 16 MiB
if _VMEM_CAPACITY_BYTES >= 96 * 1024 * 1024:
    _PER_BUFFER_BYTES = 8 * 1024 * 1024
    _BASE_VMEM_LIMIT = 64 * 1024 * 1024
else:
    _PER_BUFFER_BYTES = 4 * 1024 * 1024
    _BASE_VMEM_LIMIT = 40 * 1024 * 1024


def _mse_partial_kernel(x_ref, t_ref, out_ref, *, block_rows, steps_per_split,
                        valid_rows, needs_mask):
    """Accumulate per-lane partial sums of (x - t)^2 into a (1, 1, cols) row.

    Grid: (num_splits, steps_per_split).  The output block is resident across
    the inner ("arbitrary") axis and acts as the accumulator; the outer axis is
    CORE_PARALLEL on multi-TensorCore chips (each core owns its own partial).
    """
    c = pl.program_id(0)
    s = pl.program_id(1)

    @pl.when(s == 0)
    def _init():
        out_ref[...] = jnp.zeros_like(out_ref)

    # Cast inside the kernel (VPU work hidden under DMA); inputs may be bf16.
    # TODO(synk): on v6e/v7x a bf16 subtract before the f32 cast would halve the
    # VALU ops/byte, but v5e has no bf16 VALU, so keep the portable cast-first.
    d = x_ref[...].astype(jnp.float32) - t_ref[...].astype(jnp.float32)

    if not needs_mask:
        # Fast path: every block is fully in range, no masking anywhere.
        out_ref[...] += jnp.sum(d * d, axis=0, keepdims=True)[None]
    else:
        # Gate the mask so only the ragged tail / clamped overhang block pays
        # for iota+compare+select; full blocks keep the roofline path.
        blk = c * steps_per_split + s                  # logical (un-clamped) block
        row_start = blk * block_rows
        is_full = row_start + block_rows <= valid_rows

        @pl.when(is_full)
        def _full_block():
            out_ref[...] += jnp.sum(d * d, axis=0, keepdims=True)[None]

        @pl.when(jnp.logical_not(is_full))
        def _ragged_block():
            row = row_start + lax.broadcasted_iota(jnp.int32, d.shape, 0)
            dm = jnp.where(row < valid_rows, d, 0.0)
            out_ref[...] += jnp.sum(dm * dm, axis=0, keepdims=True)[None]


@functools.partial(jax.jit, static_argnames=("block_rows",))
def content_loss_forward(x, target, *, block_rows=None):
    """Returns (input_passthrough, mse_loss_scalar) matching ContentLoss.forward."""
    assert x.shape == target.shape, "input/target must have identical shapes"
    n_elems = x.size
    itemsize = x.dtype.itemsize

    # Collapse only the leading dims; keep the minor dim as the lane dim.
    # (B,C,H,W) -> (B*C*H, W): layout-preserving (no pad, no re-laning to 128).
    cols = x.shape[-1] if x.ndim >= 1 else 1
    cols = max(int(cols), 1)
    rows = max(n_elems // cols, 1)
    xf = x.reshape(rows, cols)
    tf = target.reshape(rows, cols)

    # Block sizing from the per-generation VMEM budget; multiple of 8 sublanes
    # (or the full row extent), never larger than needed.
    rows_budget = max(8, (_PER_BUFFER_BYTES // (cols * itemsize)) // 8 * 8)
    if block_rows is None:
        brows = rows_budget
    else:
        brows = max(8, (int(block_rows) // 8) * 8)
    if brows >= rows:
        brows = rows                       # single block row-wise (full dim)
    blocks_total = pl.cdiv(rows, brows)

    # Split the reduction across TensorCores only when the chip has >1 TC
    # (v7x); on v5e/v6e this stays 1 (no overhang re-reads, no forced mask).
    num_splits = 2 if (_NUM_TENSORCORES >= 2 and blocks_total >= 2) else 1
    steps_per_split = pl.cdiv(blocks_total, num_splits)

    ragged_rows = (rows % brows) != 0
    overhang = num_splits * steps_per_split != blocks_total
    needs_mask = ragged_rows or overhang

    def in_index_map(c, s):
        blk = c * steps_per_split + s
        if overhang:
            # Re-read the last block; it is fully masked to zero in-kernel.
            blk = jnp.minimum(blk, blocks_total - 1)
        return (blk, 0)

    kernel = functools.partial(
        _mse_partial_kernel,
        block_rows=brows,
        steps_per_split=steps_per_split,
        valid_rows=rows,
        needs_mask=needs_mask,
    )

    block_bytes = brows * cols * itemsize
    vmem_limit = int(max(_BASE_VMEM_LIMIT, 4 * block_bytes + (2 << 20)))
    outer_sem = pltpu.CORE_PARALLEL if num_splits > 1 else pltpu.ARBITRARY

    cost = pl.CostEstimate(
        flops=int(3 * n_elems),
        transcendentals=0,
        bytes_accessed=int(2 * n_elems * itemsize),
    )

    partial_sums = pl.pallas_call(
        kernel,
        out_shape=jax.ShapeDtypeStruct((num_splits, 1, cols), jnp.float32),
        grid_spec=pltpu.PrefetchScalarGridSpec(
            num_scalar_prefetch=0,
            grid=(num_splits, steps_per_split),
            in_specs=[
                pl.BlockSpec((brows, cols), in_index_map),
                pl.BlockSpec((brows, cols), in_index_map),
            ],
            out_specs=pl.BlockSpec((1, 1, cols), lambda c, s: (c, 0, 0)),
        ),
        compiler_params=pltpu.CompilerParams(
            dimension_semantics=(outer_sem, pltpu.ARBITRARY),
            vmem_limit_bytes=vmem_limit,
        ),
        cost_estimate=cost,
    )(xf, tf)

    loss = jnp.sum(partial_sums) / jnp.float32(n_elems)
    # Module returns its input unchanged; the loss is a side product.
    # TODO(synk): PyTorch stores the loss on `self.loss` (stateful); here it is
    # returned alongside the passthrough instead.
    return x, loss


def _check(x, target, *, rtol=1e-5, atol=1e-6, **kw):
    out, loss = content_loss_forward(x, target, **kw)
    out, loss = jax.block_until_ready((out, loss))
    ref_loss = jnp.mean((x.astype(jnp.float32) - target.astype(jnp.float32)) ** 2)
    assert out.shape == x.shape and out.dtype == x.dtype
    assert bool(jnp.allclose(out, x)), "passthrough mismatch"
    assert bool(jnp.allclose(loss, ref_loss, rtol=rtol, atol=atol)), (
        f"loss mismatch: {loss} vs {ref_loss}"
    )


if __name__ == "__main__":
    key = jax.random.PRNGKey(0)
    kx, kt = jax.random.split(key)

    # 1) Main case: NCHW f32, small shapes (single block, no mask).
    B, C, H, W = 2, 4, 16, 16
    x = jax.random.normal(kx, (B, C, H, W), dtype=jnp.float32)
    target = jax.random.normal(kt, (B, C, H, W), dtype=jnp.float32)
    _check(x, target)

    # 2) Multi-block path (forced tiny block to exercise the grid loop).
    _check(x, target, block_rows=8)

    # 3) Ragged row count (255 rows of 19 lanes) + masked tail block.
    xr = jax.random.normal(kx, (3, 5, 17, 19), dtype=jnp.float32)
    tr = jax.random.normal(kt, (3, 5, 17, 19), dtype=jnp.float32)
    _check(xr, tr)
    _check(xr, tr, block_rows=8)

    # 4) bf16 activations: fed to the kernel un-cast (half the HBM read bytes).
    _check(x.astype(jnp.bfloat16), target.astype(jnp.bfloat16), rtol=1e-3)

    print("KERNEL_OK")
</pallas_src>

<mosaic_0001>
module attributes {stable_mosaic.version = 11 : i64} {
  func.func @_mse_partial_kernel(%arg0: i32, %arg1: i32, %arg2: memref<128x16xf32, #tpu.memory_space<vmem>>, %arg3: memref<128x16xf32, #tpu.memory_space<vmem>>, %arg4: memref<1x1x16xf32, #tpu.memory_space<vmem>>) attributes {dimension_semantics = [#tpu.dimension_semantics<arbitrary>, #tpu.dimension_semantics<arbitrary>], iteration_bounds = array<i64: 1, 1>, scalar_prefetch = 0 : i64, scratch_operands = 0 : i64, tpu.core_type = #tpu.core_type<tc>, window_params = [{transform_indices = @transform_0, window_bounds = array<i64: 128, 16>}, {transform_indices = @transform_1, window_bounds = array<i64: 128, 16>}, {transform_indices = @transform_2, window_bounds = array<i64: 1, 1, 16>}]} {
    %c0_i32 = arith.constant 0 : i32
    %0 = arith.cmpi eq, %arg1, %c0_i32 : i32
    %1 = arith.extui %0 : i1 to i32
    %c0_i32_0 = arith.constant 0 : i32
    %2 = arith.cmpi ne, %1, %c0_i32_0 : i32
    scf.if %2 {
      %cst_10 = arith.constant 0.000000e+00 : f32
      %13 = vector.broadcast %cst_10 : f32 to vector<1x1x16xf32>
      %c0_11 = arith.constant 0 : index
      %c0_12 = arith.constant 0 : index
      %c0_13 = arith.constant 0 : index
      %14 = vector.load %arg4[%c0_11, %c0_12, %c0_13] : memref<1x1x16xf32, #tpu.memory_space<vmem>>, vector<1x1x16xf32>
      tpu.vector_store %arg4[%c0_11, %c0_12, %c0_13], %13 {strides = array<i32>} : memref<1x1x16xf32, #tpu.memory_space<vmem>>, vector<1x1x16xf32>,
    } else {
    }
    %c0 = arith.constant 0 : index
    %c0_1 = arith.constant 0 : index
    %3 = vector.load %arg2[%c0, %c0_1] : memref<128x16xf32, #tpu.memory_space<vmem>>, vector<128x16xf32>
    %c0_2 = arith.constant 0 : index
    %c0_3 = arith.constant 0 : index
    %4 = vector.load %arg3[%c0_2, %c0_3] : memref<128x16xf32, #tpu.memory_space<vmem>>, vector<128x16xf32>
    %5 = arith.subf %3, %4 : vector<128x16xf32>
    %c0_4 = arith.constant 0 : index
    %c0_5 = arith.constant 0 : index
    %c0_6 = arith.constant 0 : index
    %6 = vector.load %arg4[%c0_4, %c0_5, %c0_6] : memref<1x1x16xf32, #tpu.memory_space<vmem>>, vector<1x1x16xf32>
    %7 = arith.mulf %5, %5 : vector<128x16xf32>
    %cst = arith.constant dense<0.000000e+00> : vector<16xf32>
    %8 = vector.multi_reduction <add>, %7, %cst [0] : vector<128x16xf32> to vector<16xf32>
    %9 = vector.shape_cast %8 : vector<16xf32> to vector<1x16xf32>
    %10 = vector.shape_cast %9 : vector<1x16xf32> to vector<1x1x16xf32>
    %11 = arith.addf %6, %10 : vector<1x1x16xf32>
    %c0_7 = arith.constant 0 : index
    %c0_8 = arith.constant 0 : index
    %c0_9 = arith.constant 0 : index
    %12 = vector.load %arg4[%c0_7, %c0_8, %c0_9] : memref<1x1x16xf32, #tpu.memory_space<vmem>>, vector<1x1x16xf32>
    tpu.vector_store %arg4[%c0_7, %c0_8, %c0_9], %11 {strides = array<i32>} : memref<1x1x16xf32, #tpu.memory_space<vmem>>, vector<1x1x16xf32>,
    return
  }
  func.func @transform_0(%arg0: i32, %arg1: i32) -> (i32, i32) {
    %c1_i32 = arith.constant 1 : i32
    %0 = arith.muli %arg0, %c1_i32 : i32
    %1 = arith.addi %0, %arg1 : i32
    %c0_i32 = arith.constant 0 : i32
    %c0_i32_0 = arith.constant 0 : i32
    return %1, %c0_i32 : i32, i32
  }
  func.func @transform_1(%arg0: i32, %arg1: i32) -> (i32, i32) {
    %c1_i32 = arith.constant 1 : i32
    %0 = arith.muli %arg0, %c1_i32 : i32
    %1 = arith.addi %0, %arg1 : i32
    %c0_i32 = arith.constant 0 : i32
    %c0_i32_0 = arith.constant 0 : i32
    return %1, %c0_i32 : i32, i32
  }
  func.func @transform_2(%arg0: i32, %arg1: i32) -> (i32, i32, i32) {
    %c0_i32 = arith.constant 0 : i32
    %c0_i32_0 = arith.constant 0 : i32
    %c0_i32_1 = arith.constant 0 : i32
    return %arg0, %c0_i32, %c0_i32_0 : i32, i32, i32
  }
}

</mosaic_0001>

<bundles_post_ra>
// kernel: content_loss_forward.1
= control target key start
LH: loop header
LB: loop body
LE: loop exit
PB: predicated region body
PF: predicated region fallthrough
CT: control target
= control target key end

     0   :  { %7 = vsyncpa [#allocation3], 0  ;;  %s293_s0 = inlined_call_operand.hbm [shape: f32[128,16], index: 0, kind: input, shape index: {}]   ;;  %s294_s1 = inlined_call_operand.hbm [shape: f32[128,16], index: 1, kind: input, shape index: {}]   ;;  %s295_s2 = inlined_call_operand.vmem [shape: f32[1,1,16], index: 2, kind: output, shape index: {}]  }
   0x1   :  { %8 = vsyncpa [#allocation5], 0  ;;  %s222_s9 = smov [#allocation2]   ;;  %s174_s13 = scalar_lea.hbm %s293_s0, 2048 }
   0x2   :  { %s18_s10 = sshll.u32 %s222_s9, 4  ;;  %p175_p0 = scmp.ne.s32.totalorder %s293_s0, %s174_s13  ;;  %s19_s10 = int_to_ptr.vmem [resolvable:$true] %s18_s10 }
   0x3   :  { %p178_p1 = scmp.lt.u32.totalorder %s174_s13, %s293_s0 }
   0x5   :  { %p180_p2 = pnand %p178_p1, %p175_p0 }
   0x7   :  { %183 = shalt.err (!%p180_p2)
}
   0x8   :  { %s184_s18 = scalar_lea.vmem %s19_s10, 2048  ;;  %p189_p4 = scmp.lt.s32.totalorder %s19_s10, %s19_s10 }
   0x9   :  { %p185_p3 = scmp.ne.s32.totalorder %s19_s10, %s184_s18  ;;  %p190_p5 = scmp.lt.s32.totalorder %s184_s18, %s184_s18 }
   0xb   :  { %p191_p6 = por %p190_p5, %p189_p4 }
   0xd   :  { %p192_p7 = pnand %p191_p6, %p185_p3 }
   0xf   :  { %195 = shalt.err (!%p192_p7)
}
  0x10   :  { %s223_s19 = smov 128   ;;  %s224_s20 = smov 8  }
  0x11   :  { %24 = dma.hbm_to_vmem [thread:$0]  %s293_s0, 2048, %s19_s10, [#allocation3], %s223_s19, %s223_s19, %s224_s20  }
  0x12   :  { %s225_s23 = smov [#allocation4]   ;;  %s196_s27 = scalar_lea.hbm %s294_s1, 2048 }
  0x13   :  { %s34_s24 = sshll.u32 %s225_s23, 4  ;;  %p197_p8 = scmp.ne.s32.totalorder %s294_s1, %s196_s27  ;;  %s35_s24 = int_to_ptr.vmem [resolvable:$true] %s34_s24 }
  0x14   :  { %p200_p9 = scmp.lt.u32.totalorder %s196_s27, %s294_s1 }
  0x16   :  { %p202_p10 = pnand %p200_p9, %p197_p8 }
  0x18   :  { %205 = shalt.err (!%p202_p10)
}
  0x19   :  { %s206_s4 = scalar_lea.vmem %s35_s24, 2048  ;;  %p211_p12 = scmp.lt.s32.totalorder %s35_s24, %s35_s24 }
  0x1a   :  { %p207_p11 = scmp.ne.s32.totalorder %s35_s24, %s206_s4  ;;  %p212_p13 = scmp.lt.s32.totalorder %s206_s4, %s206_s4 }
  0x1c   :  { %p213_p0 = por %p212_p13, %p211_p12 }
  0x1e   :  { %p214_p1 = pnand %p213_p0, %p207_p11 }
  0x20   :  { %217 = shalt.err (!%p214_p1)
}
  0x21   :  { %40 = dma.hbm_to_vmem [thread:$0]  %s294_s1, 2048, %s35_s24, [#allocation5], %s223_s19, %s223_s19, %s224_s20  }
  0x22   :  { %218 = dma.done.wait [#allocation3], 2048  }
  0x23   :  { %219 = vsyncadd [#allocation3], 4294965248 }
  0x24   :  { %220 = dma.done.wait [#allocation5], 2048  }
  0x25   :  { %221 = vsyncadd [#allocation5], 4294965248  ;;  %vm55_vm0 = vcmask 122880   ;;  %v226_v0 = vmov 0.0   ;;  %v57_v1 = vld [vmem:[#allocation2] sm:$0xff]  ;;  %v58_v2 = vld [vmem:[#allocation2 + $0x8] sm:$0xff] }
  0x26   :  { %56 = vst.msk [vmem:[%s295_s2] sm:$0x1] %vm55_vm0, %v226_v0  ;;  %v59_v3 = vld [vmem:[#allocation2 + $0x10] sm:$0xff]  ;;  %v73_v4 = vld [vmem:[#allocation4] sm:$0xff]  ;;  %v74_v5 = vld [vmem:[#allocation4 + $0x8] sm:$0xff]  ;;  %vm122_vm1 = vcmask 130048  }
  0x27   :  { %v60_v6 = vld [vmem:[#allocation2 + $0x18] sm:$0xff]  ;;  %v75_v7 = vld [vmem:[#allocation4 + $0x10] sm:$0xff]  ;;  %v89_v9 = vsub.f32 %v57_v1, %v73_v4  ;;  %v90_v10 = vsub.f32 %v58_v2, %v74_v5  ;;  %v61_v12 = vld [vmem:[#allocation2 + $0x20] sm:$0xff] }
  0x28   :  { %v76_v8 = vld [vmem:[#allocation4 + $0x18] sm:$0xff]  ;;  %v91_v11 = vsub.f32 %v59_v3, %v75_v7  ;;  %v77_v13 = vld [vmem:[#allocation4 + $0x20] sm:$0xff]  ;;  %v62_v15 = vld [vmem:[#allocation2 + $0x28] sm:$0xff] }
  0x29   :  { %v92_v14 = vsub.f32 %v60_v6, %v76_v8  ;;  %v78_v16 = vld [vmem:[#allocation4 + $0x28] sm:$0xff]  ;;  %v106_v17 = vmul.f32 %v89_v9, %v89_v9  ;;  %v93_v18 = vsub.f32 %v61_v12, %v77_v13  ;;  %v107_v19 = vmul.f32 %v90_v10, %v90_v10  ;;  %v63_v21 = vld [vmem:[#allocation2 + $0x30] sm:$0xff]  ;;  %v64_v25 = vld [vmem:[#allocation2 + $0x38] sm:$0xff] }
  0x2a   :  { %v108_v20 = vmul.f32 %v91_v11, %v91_v11  ;;  %v79_v22 = vld [vmem:[#allocation4 + $0x30] sm:$0xff]  ;;  %v94_v23 = vsub.f32 %v62_v15, %v78_v16  ;;  %v80_v26 = vld [vmem:[#allocation4 + $0x38] sm:$0xff]  ;;  %v65_v32 = vld [vmem:[#allocation2 + $0x40] sm:$0xff] }
  0x2b   :  { %v109_v24 = vmul.f32 %v92_v14, %v92_v14  ;;  %v123_v27 = vsel %vm122_vm1, %v106_v17, 0.0  ;;  %v95_v28 = vsub.f32 %v63_v21, %v79_v22  ;;  %v110_v29 = vmul.f32 %v93_v18, %v93_v18  ;;  %v81_v33 = vld [vmem:[#allocation4 + $0x40] sm:$0xff]  ;;  %v66_v38 = vld [vmem:[#allocation2 + $0x48] sm:$0xff]  ;;  %v67_v44 = vld [vmem:[#allocation2 + $0x50] sm:$0xff] }
  0x2c   :  { %v124_v30 = vsel %vm122_vm1, %v107_v19, 0.0  ;;  %v126_v31 = vsel %vm122_vm1, %v108_v20, 0.0  ;;  %v96_v35 = vsub.f32 %v64_v25, %v80_v26  ;;  %v111_v36 = vmul.f32 %v94_v23, %v94_v23  ;;  %v82_v39 = vld [vmem:[#allocation4 + $0x48] sm:$0xff]  ;;  %v83_v45 = vld [vmem:[#allocation4 + $0x50] sm:$0xff]  ;;  %v68_v50 = vld [vmem:[#allocation2 + $0x58] sm:$0xff] }
  0x2d   :  { %v125_v34 = vadd.f32 %v124_v30, %v123_v27  ;;  %v128_v37 = vsel %vm122_vm1, %v109_v24, 0.0  ;;  %v97_v41 = vsub.f32 %v65_v32, %v81_v33  ;;  %v112_v42 = vmul.f32 %v95_v28, %v95_v28  ;;  %v84_v51 = vld [vmem:[#allocation4 + $0x58] sm:$0xff]  ;;  %v69_v56 = vld [vmem:[#allocation2 + $0x60] sm:$0xff]  ;;  %v70_v62 = vld [vmem:[#allocation2 + $0x68] sm:$0xff] }
  0x2e   :  { %v130_v43 = vsel %vm122_vm1, %v110_v29, 0.0  ;;  %v98_v47 = vsub.f32 %v66_v38, %v82_v39  ;;  %v113_v48 = vmul.f32 %v96_v35, %v96_v35  ;;  %v132_v49 = vsel %vm122_vm1, %v111_v36, 0.0  ;;  %v85_v57 = vld [vmem:[#allocation4 + $0x60] sm:$0xff]  ;;  %v86_v63 = vld [vmem:[#allocation4 + $0x68] sm:$0xff]  ;;  %v71_v4 = vld [vmem:[#allocation2 + $0x70] sm:$0xff] }
  0x2f   :  { %v127_v40 = vadd.f32 %v126_v31, %v125_v34  ;;  %v99_v53 = vsub.f32 %v67_v44, %v83_v45  ;;  %v114_v54 = vmul.f32 %v97_v41, %v97_v41  ;;  %v134_v55 = vsel %vm122_vm1, %v112_v42, 0.0  ;;  %v87_v5 = vld [vmem:[#allocation4 + $0x70] sm:$0xff]  ;;  %v72_v10 = vld [vmem:[#allocation2 + $0x78] sm:$0xff] }
  0x30   :  { %v100_v59 = vsub.f32 %v68_v50, %v84_v51  ;;  %v115_v60 = vmul.f32 %v98_v47, %v98_v47  ;;  %v136_v61 = vsel %vm122_vm1, %v113_v48, 0.0  ;;  %v101_v1 = vsub.f32 %v69_v56, %v85_v57  ;;  %v88_v11 = vld [vmem:[#allocation4 + $0x78] sm:$0xff] }
  0x31   :  { %v129_v46 = vadd.f32 %v128_v37, %v127_v40  ;;  %v116_v2 = vmul.f32 %v99_v53, %v99_v53  ;;  %v138_v3 = vsel %vm122_vm1, %v114_v54, 0.0  ;;  %v102_v7 = vsub.f32 %v70_v62, %v86_v63  ;;  %v105_v37 = vld [vmem:[%s295_s2] sm:$0x1] }
  0x32   :  { %v117_v8 = vmul.f32 %v100_v59, %v100_v59  ;;  %v140_v9 = vsel %vm122_vm1, %v115_v60, 0.0  ;;  %v103_v13 = vsub.f32 %v71_v4, %v87_v5  ;;  %v118_v14 = vmul.f32 %v101_v1, %v101_v1 }
  0x33   :  { %v131_v52 = vadd.f32 %v130_v43, %v129_v46  ;;  %v142_v15 = vsel %vm122_vm1, %v116_v2, 0.0  ;;  %v104_v17 = vsub.f32 %v72_v10, %v88_v11  ;;  %v119_v18 = vmul.f32 %v102_v7, %v102_v7 }
  0x34   :  { %v144_v19 = vsel %vm122_vm1, %v117_v8, 0.0  ;;  %v120_v21 = vmul.f32 %v103_v13, %v103_v13  ;;  %v146_v22 = vsel %vm122_vm1, %v118_v14, 0.0 }
  0x35   :  { %v133_v58 = vadd.f32 %v132_v49, %v131_v52  ;;  %v121_v24 = vmul.f32 %v104_v17, %v104_v17  ;;  %v148_v25 = vsel %vm122_vm1, %v119_v18, 0.0 }
  0x36   :  { %v150_v27 = vsel %vm122_vm1, %v120_v21, 0.0 }
  0x37   :  { %v135_v0 = vadd.f32 %v134_v55, %v133_v58  ;;  %v152_v29 = vsel %vm122_vm1, %v121_v24, 0.0 }
  0x39   :  { %v137_v6 = vadd.f32 %v136_v61, %v135_v0 }
  0x3b   :  { %v139_v12 = vadd.f32 %v138_v3, %v137_v6 }
  0x3d   :  { %v141_v16 = vadd.f32 %v140_v9, %v139_v12 }
  0x3f   :  { %v143_v20 = vadd.f32 %v142_v15, %v141_v16 }
  0x41   :  { %v145_v23 = vadd.f32 %v144_v19, %v143_v20 }
  0x43   :  { %v147_v26 = vadd.f32 %v146_v22, %v145_v23 }
  0x45   :  { %v149_v28 = vadd.f32 %v148_v25, %v147_v26 }
  0x47   :  { %v151_v30 = vadd.f32 %v150_v27, %v149_v28 }
  0x49   :  { %v153_v31 = vadd.f32 %v152_v29, %v151_v30 }
  0x4b   :  { %v154_v32 = vrot.slane %v153_v31, 4 }
  0x4d   :  { %v155_v33 = vadd.f32 %v154_v32, %v153_v31 }
  0x4f   :  { %v156_v34 = vrot.slane %v155_v33, 2 }
  0x51   :  { %v157_v35 = vadd.f32 %v156_v34, %v155_v33 }
  0x53   :  { %v158_v36 = vrot.slane %v157_v35, 1 }
  0x55   :  { %v159_v38 = vadd.f32 %v158_v36, %v157_v35 }
  0x57   :  { %v160_v39 = vadd.f32 %v159_v38, %v105_v37 }
  0x59   :  { %162 = vst.msk [vmem:[%s295_s2] sm:$0x1] %vm55_vm0, %v160_v39 }
  0x5a   :  { %167 = vsyncpa [#allocation3], 1 }
  0x5b   :  { %168 = vsyncpa [#allocation5], 1 }

</bundles_post_ra>
